<compile_context>
chip_gen: v7x
topology: tpu7x:2x2x1
jax: 0.10.0
libtpu: 0.0.40
codegen_flags: <defaults>
</compile_context>

<pallas_src>
import jax
import jax.numpy as jnp
from jax.experimental import pallas as pl
from jax.experimental.pallas import tpu as pltpu


def _make_reset_seed_kernel(seed_hw_prng: bool):
    """Build the kernel body; `seed_hw_prng` is baked in at trace time."""

    def kernel(seed_ref, x_ref, o_ref):
        # x_ref / o_ref live in HBM (pl.ANY) and are aliased at the XLA level,
        # so the identity pass-through costs zero bytes of traffic: nothing to
        # read, nothing to write back.
        del x_ref, o_ref
        if seed_hw_prng:
            # Mirror torch.manual_seed(self.seed): reseed the TPU hardware PRNG.
            pltpu.prng_seed(seed_ref[0])
        else:
            # prng_seed has no CPU/interpret lowering; keep a trivial SMEM scalar
            # read so the traced kernel body is never empty on non-TPU backends.
            _ = seed_ref[0]

    return kernel


def reset_seed_forward(x: jax.Array, seed: int) -> jax.Array:
    """Pallas equivalent of ResetSeed(seed).forward(x): reseed PRNG, return x."""
    seed_arr = jnp.asarray([seed], dtype=jnp.int32)          # (1,) scalar in SMEM
    seed_hw_prng = jax.default_backend() == "tpu"            # prng_seed is TPU-only

    return pl.pallas_call(
        _make_reset_seed_kernel(seed_hw_prng),
        out_shape=jax.ShapeDtypeStruct(x.shape, x.dtype),
        in_specs=[
            # seed: tiny scalar, goes straight to SMEM (no scalar-prefetch
            # plumbing needed -- no index_map depends on it).
            pl.BlockSpec(memory_space=pltpu.MemorySpace.SMEM),
            # x: left in place in HBM; never DMA'd since the forward is identity.
            pl.BlockSpec(memory_space=pl.ANY),
        ],
        out_specs=pl.BlockSpec(memory_space=pl.ANY),
        # Output 0 aliases input 1 (x): the "copy" is pure buffer aliasing, so
        # the kernel does nothing but the PRNG reseed.  Works identically on
        # v5e / v6e / v7x since no VMEM tiling is involved at all.
        input_output_aliases={1: 0},
        compiler_params=pltpu.CompilerParams(
            has_side_effects=True,   # keep the reseed from being DCE'd
        ),
    )(seed_arr, x)


if __name__ == "__main__":
    key = jax.random.PRNGKey(0)
    # Small NCHW input, consistent with a typical conv-net activation tensor.
    x = jax.random.normal(key, (2, 4, 16, 16), dtype=jnp.float32)

    seed = 42
    y = reset_seed_forward(x, seed)
    y = jax.block_until_ready(y)

    # forward(x) is the identity on x.  Compare against a freshly regenerated
    # copy so the check is immune to any buffer donation from the in/out alias.
    expected = jax.random.normal(jax.random.PRNGKey(0), (2, 4, 16, 16),
                                 dtype=jnp.float32)
    assert y.shape == expected.shape and y.dtype == expected.dtype
    assert bool(jnp.all(y == expected))

    print("KERNEL_OK")
</pallas_src>

<mosaic_0001>
module attributes {stable_mosaic.version = 11 : i64} {
  func.func @kernel(%arg0: memref<1xi32, #tpu.memory_space<smem>>, %arg1: memref<2x4x16x16xf32, #tpu.memory_space<any>>, %arg2: memref<2x4x16x16xf32, #tpu.memory_space<any>>) attributes {dimension_semantics = [], scalar_prefetch = 0 : i64, scratch_operands = 0 : i64, tpu.core_type = #tpu.core_type<tc>} {
    return
  }
}

</mosaic_0001>

<bundles_post_ra>
// kernel: tpu_custom_call.1
= control target key start
LH: loop header
LB: loop body
LE: loop exit
PB: predicated region body
PF: predicated region fallthrough
CT: control target
= control target key end

     0   :  { %s25_s0 = inlined_call_operand.<no memory space> [shape: s32[1], index: 0, kind: input, shape index: {}]   ;;  %s26_s1 = inlined_call_operand.hbm [shape: f32[2,4,16,16], index: 1, kind: input, shape index: {}, may-alias: {1,2}]   ;;  %s27_s2 = inlined_call_operand.hbm [shape: f32[2,4,16,16], index: 2, kind: output, shape index: {}, may-alias: {1,2}]  }

</bundles_post_ra>
